<compile_context>
chip_gen: v5e
topology: v5e:2x2
jax: 0.10.0
libtpu: 0.0.40
codegen_flags: <defaults>
</compile_context>

<pallas_src>
import jax
import jax.numpy as jnp
from jax.experimental import pallas as pl
from jax.experimental.pallas import tpu as pltpu


def _refine_classifier_kernel(w_ref, x_ref, o_ref):
    # w_ref: (N, C)   classifier weight (whole array, VMEM resident)
    # x_ref: (C, THW) pixel tile in NCHW-native orientation
    # o_ref: (N, THW) output tile (lane-dense along the pixel axis)
    o_ref[...] = jnp.dot(
        w_ref[...], x_ref[...], preferred_element_type=jnp.float32
    ).astype(o_ref.dtype)


def _round_down_128(v):
    return (v // 128) * 128


def refine_classifier_forward(x_nchw, weight_oc_ic, *, tile_hw=None):
    """Forward of Refine_Classifier.

    Args:
      x_nchw:       (B, feature_num, H, W) input, NCHW (PyTorch convention).
      weight_oc_ic: (n_classes, feature_num) — 1x1 conv weight, spatial dims squeezed.
      tile_hw:      optional pixel-tile override (rounded up to a multiple of 128).

    Returns:
      Exactly `self.classifier(x).view(-1, n_classes)` (NCHW flatten semantics).
    """
    B, C, H, W = x_nchw.shape
    n_classes = weight_oc_ic.shape[0]
    HW = H * W
    itemsize = jnp.dtype(x_nchw.dtype).itemsize

    # Free reshape: NCHW -> (B, C, H*W).  No transpose, no HBM round-trip.
    x = x_nchw.reshape(B, C, HW)
    # Cast weight to activation dtype: deterministic numerics and the fast
    # bf16 x bf16 -> f32 MXU path when activations are bf16.
    w = weight_oc_ic.astype(x_nchw.dtype)

    # ---- pixel-tile sizing --------------------------------------------------
    if tile_hw is not None:
        if tile_hw <= 0:
            raise ValueError(f"tile_hw must be positive, got {tile_hw}")
        tile_hw = pl.cdiv(tile_hw, 128) * 128   # lane-align user-supplied tile
    else:
        # Target a big (~8 MiB) x tile to amortize the ~0.35 us/step overhead.
        target_bytes = 8 << 20
        tile_hw = (target_bytes // max(1, C * itemsize)) // 128 * 128
    tile_hw = max(128, min(tile_hw, 65536))

    # Generation-aware VMEM budget (v7x: 64 MiB physical; v5e/v6e: 128 MiB).
    try:
        vmem_cap = int(pltpu.get_tpu_info().vmem_capacity_bytes)
    except Exception:
        vmem_cap = 64 << 20  # conservative (v7x-sized) fallback
    vmem_budget = min(vmem_cap * 7 // 10, 96 << 20)

    # Clamp the tile so double-buffered x + out tiles fit the budget with
    # ~2x headroom (weight is tiny and resident).
    per_col_bytes = itemsize * 2 * (C + n_classes)
    tile_cap_vmem = _round_down_128(max(128, (vmem_budget // 2) // max(1, per_col_bytes)))
    tile_hw = min(tile_hw, tile_cap_vmem)

    if HW < 128:
        # Block equals the full (tiny) lane dim; masked stores are irrelevant here.
        tile_hw = HW
    else:
        tile_hw = min(tile_hw, _round_down_128(HW))
        if B == 1 and HW >= 256:
            # Guarantee >= 2 parallel grid steps so both v7x TensorCores issue DMAs.
            half_blocks = pl.cdiv(pl.cdiv(HW, 128), 2)
            tile_hw = min(tile_hw, half_blocks * 128)

    grid = (B, pl.cdiv(HW, tile_hw))

    per_step_bytes = itemsize * (2 * (C + n_classes) * tile_hw + n_classes * C)
    vmem_limit = int(min(vmem_budget, max(16 << 20, 2 * per_step_bytes)))

    cost = pl.CostEstimate(
        flops=2 * B * HW * C * n_classes,
        transcendentals=0,
        bytes_accessed=itemsize * (B * C * HW + n_classes * C + B * n_classes * HW),
    )

    out = pl.pallas_call(
        _refine_classifier_kernel,
        out_shape=jax.ShapeDtypeStruct((B, n_classes, HW), x.dtype),
        grid=grid,
        in_specs=[
            # Weight: whole array, VMEM resident, outside the pipeline.
            pl.BlockSpec(memory_space=pltpu.MemorySpace.VMEM),
            # Activations: one (C, tile_hw) pixel tile per grid step.
            pl.BlockSpec((None, C, tile_hw), lambda b, j: (b, 0, j)),
        ],
        out_specs=pl.BlockSpec((None, n_classes, tile_hw), lambda b, j: (b, 0, j)),
        compiler_params=pltpu.CompilerParams(
            dimension_semantics=("parallel", "parallel"),
            vmem_limit_bytes=vmem_limit,
        ),
        cost_estimate=cost,
    )(w, x)

    # (B, N, H*W) flattened row-major IS NCHW memory order, so this reproduces
    # PyTorch's `x.view(-1, n_classes)` on the conv output exactly.
    return out.reshape(-1, n_classes)


if __name__ == "__main__":
    # Small shapes consistent with the module (feature_num scaled down).
    n_classes = 2
    feature_num = 32

    key = jax.random.PRNGKey(0)
    kx, kw = jax.random.split(key)
    weight = jax.random.normal(kw, (n_classes, feature_num), dtype=jnp.float32) * 0.02

    def ref_fn(x, w):
        return jnp.einsum("bchw,nc->bnhw", x, w).reshape(-1, n_classes)

    # 1) Tile-aligned spatial size.
    x = jax.random.normal(kx, (2, feature_num, 16, 16), dtype=jnp.float32)
    out = refine_classifier_forward(x, weight)
    jax.block_until_ready(out)
    ref = ref_fn(x, weight)
    assert out.shape == ref.shape == (2 * 16 * 16, n_classes)
    assert jnp.allclose(out, ref, atol=1e-5, rtol=1e-5)

    # 2) Tiny ragged spatial size (H*W < 128): full-dim lane block path.
    x2 = jax.random.normal(kx, (2, feature_num, 5, 7), dtype=jnp.float32)
    out2 = refine_classifier_forward(x2, weight)
    jax.block_until_ready(out2)
    ref2 = ref_fn(x2, weight)
    assert out2.shape == ref2.shape
    assert jnp.allclose(out2, ref2, atol=1e-5, rtol=1e-5)

    # 3) Ragged H*W > 128 (not a multiple of the tile): exercises the no-pad
    #    path where the last block's OOB lanes are masked on write, plus the
    #    B == 1 multi-tile split.
    x3 = jax.random.normal(kx, (1, feature_num, 13, 17), dtype=jnp.float32)
    out3 = refine_classifier_forward(x3, weight)
    jax.block_until_ready(out3)
    ref3 = ref_fn(x3, weight)
    assert out3.shape == ref3.shape
    assert jnp.allclose(out3, ref3, atol=1e-5, rtol=1e-5)

    print("KERNEL_OK")
</pallas_src>

<mosaic_0001>
module attributes {stable_mosaic.version = 11 : i64} {
  func.func @_refine_classifier_kernel(%arg0: i32, %arg1: i32, %arg2: memref<2x32xf32, #tpu.memory_space<vmem>>, %arg3: memref<1x32x256xf32, #tpu.memory_space<vmem>>, %arg4: memref<1x2x256xf32, #tpu.memory_space<vmem>>) attributes {dimension_semantics = [#tpu.dimension_semantics<parallel>, #tpu.dimension_semantics<parallel>], iteration_bounds = array<i64: 2, 1>, scalar_prefetch = 0 : i64, scratch_operands = 0 : i64, tpu.core_type = #tpu.core_type<tc>, window_params = [{pipeline_mode = #tpu.pipeline_mode<synchronous>, transform_indices = @transform_0, window_bounds = array<i64: 2, 32>}, {transform_indices = @transform_1, window_bounds = array<i64: 1, 32, 256>}, {transform_indices = @transform_2, window_bounds = array<i64: 1, 2, 256>}]} {
    %c0 = arith.constant 0 : index
    %c0_0 = arith.constant 0 : index
    %0 = vector.load %arg2[%c0, %c0_0] : memref<2x32xf32, #tpu.memory_space<vmem>>, vector<2x32xf32>
    %c0_1 = arith.constant 0 : index
    %c0_2 = arith.constant 0 : index
    %c0_3 = arith.constant 0 : index
    %1 = vector.load %arg3[%c0_1, %c0_2, %c0_3] : memref<1x32x256xf32, #tpu.memory_space<vmem>>, vector<1x32x256xf32>
    %2 = vector.shape_cast %1 : vector<1x32x256xf32> to vector<32x256xf32>
    %cst = arith.constant dense<0.000000e+00> : vector<2x256xf32>
    %3 = tpu.matmul %0, %2, %cst {dimension_numbers = #tpu.dot_dimension_numbers<[1], [0], [0], [1], [0, 0, 1, 1], [], []>} : vector<2x32xf32>, vector<32x256xf32>, vector<2x256xf32> -> vector<2x256xf32>
    %c0_4 = arith.constant 0 : index
    %c0_5 = arith.constant 0 : index
    %c0_6 = arith.constant 0 : index
    %4 = vector.load %arg4[%c0_4, %c0_5, %c0_6] : memref<1x2x256xf32, #tpu.memory_space<vmem>>, vector<1x2x256xf32>
    %5 = vector.shape_cast %4 : vector<1x2x256xf32> to vector<2x256xf32>
    %6 = vector.shape_cast %3 : vector<2x256xf32> to vector<1x2x256xf32>
    tpu.vector_store %arg4[%c0_4, %c0_5, %c0_6], %6 {strides = array<i32>} : memref<1x2x256xf32, #tpu.memory_space<vmem>>, vector<1x2x256xf32>,
    return
  }
  func.func @transform_0(%arg0: i32, %arg1: i32) -> (i32, i32) {
    %c0_i32 = arith.constant 0 : i32
    %c0_i32_0 = arith.constant 0 : i32
    %c0_i32_1 = arith.constant 0 : i32
    return %c0_i32, %c0_i32_0 : i32, i32
  }
  func.func @transform_1(%arg0: i32, %arg1: i32) -> (i32, i32, i32) {
    %c0_i32 = arith.constant 0 : i32
    %c0_i32_0 = arith.constant 0 : i32
    return %arg0, %c0_i32, %arg1 : i32, i32, i32
  }
  func.func @transform_2(%arg0: i32, %arg1: i32) -> (i32, i32, i32) {
    %c0_i32 = arith.constant 0 : i32
    %c0_i32_0 = arith.constant 0 : i32
    return %arg0, %c0_i32, %arg1 : i32, i32, i32
  }
}

</mosaic_0001>

<bundles_post_ra>
// kernel: tpu_custom_call.1
= control target key start
LH: loop header
LB: loop body
LE: loop exit
PB: predicated region body
PF: predicated region fallthrough
CT: control target
= control target key end

     0   :  { %7 = vsyncpa [#allocation3], 0  ;;  %s788_s0 = inlined_call_operand.hbm [shape: f32[2,32], index: 0, kind: input, shape index: {}]   ;;  %s789_s1 = inlined_call_operand.hbm [shape: f32[2,32,256], index: 1, kind: input, shape index: {}]   ;;  %s790_s2 = inlined_call_operand.hbm [shape: f32[2,2,256], index: 2, kind: output, shape index: {}]  }
   0x1   :  { %8 = vsyncpa [#allocation6], 0 }
   0x2   :  { %10 = vsyncpa [#allocation6 + $0x1], 0 }
   0x3   :  { %11 = vsyncpa [#allocation4], 0 }
   0x4   :  { %13 = vsyncpa [#allocation4 + $0x1], 0  ;;  %s636_s9 = smov 0   ;;  %s638_s10 = smov 0  }
   0x5   :  { %s640_s11 = smov 0   ;;  %s642_s12 = smov 0  }
   0x6   :  { %s644_s13 = smov 0   ;;  %s646_s14 = smov 0  }
   0x7 LB: > { %s374_s15 = sadd.s32 4294967295, %s616_s14   ;;  %s375_s16 = sadd.s32 4294967294, %s616_s14   ;;  %s616_s14 = sphi %s646_s14, %s19_s14   ;;  %s612_s13 = sphi %s644_s13, %s802_s13   ;;  %s608_s12 = sphi %s642_s12, %s801_s12   ;;  %s604_s11 = sphi %s640_s11, %s800_s11   ;;  %s600_s10 = sphi %s638_s10, %s799_s10   ;;  %s596_s9 = sphi %s636_s9, %s798_s9  }
   0x8   : > { %s61_s17 = sadd.s32 1, %s604_s11  ;;  %p68_p0 = scmp.ne.s32.totalorder %s604_s11, %s600_s10 }
   0x9   : > { %p69_p1 = scmp.eq.s32.totalorder %s616_s14, 0  ;;  %p74_p2 = scmp.ne.s32.totalorder %s600_s10, %s596_s9 }
   0xa   : > { %p674_p3 = scmp.eq.s32.totalorder %s374_s15, 0  ;;  %p100_p4 = scmp.eq.s32.totalorder %s374_s15, 1 }
   0xb   : > { %p678_p5 = por %p69_p1, %p68_p0  ;;  %p106_p6 = scmp.eq.s32.totalorder %s375_s16, 1 }
   0xc   : > { %p684_p7 = por %p674_p3, %p74_p2  ;;  %p688_p8 = por %p100_p4, %p68_p0 }
   0xd   : > { %p692_p9 = por %p106_p6, %p74_p2  ;;  %p376_p10 = scmp.ge.s32.totalorder %s616_s14, 1 }
   0xe   : > { %p113_p11 = scmp.lt.s32.totalorder %s616_s14, 3  ;;  %s125_s25 = sshll.u32 %s788_s0, 4  ;;  %s126_s25 = int_to_ptr.hbm [resolvable:$true] %s125_s25 }
   0xf   : > { %s618_s27 = smov [#allocation2]   ;;  %p378_p13 = scmp.ge.s32.totalorder %s616_s14, 2 }
  0x10   : > { %p701_p12 = pnand %p376_p10, %p113_p11  ;;  %s127_s28 = sshll.u32 %s618_s27, 4  ;;  %s128_s28 = int_to_ptr.vmem [resolvable:$true] %s127_s28 }
  0x11   : > { %p416_p1 = scmp.lt.s32.totalorder %s616_s14, 2  ;;  %s31_s30 = sadd.s32 1, %s612_s13 }
  0x12   : > { %p403_p0 = pneg %p701_p12  ;;  %p33_p6 = scmp.ge.s32.totalorder %s31_s30, 2 }
  0x13   : > { %p713_p4 = pnand %p416_p1, %p678_p5  ;;  %s138_s3 = sand.u32 1, %s604_s11  }
  0x14   : > { %p404_p2 = pnand %p403_p0, %p674_p3  ;;  %s804_s30 = smov (%p33_p6, %s31_s30), 0 }
  0x15   : > { %s379_s4 = sshll.u32 %s138_s3, 6  ;;  %s56_s5 = ssub.s32 %s612_s13, %s804_s30 }
  0x16   : > { %406 = dma.hbm_to_vmem [thread:$0]  (!%p404_p2), %s126_s25, 32, %s128_s28, [#allocation3]  }
  0x17   : > { %p59_p10 = scmp.eq.s32.totalorder %s56_s5, 0  ;;  %s393_s6 = sshll.u32 %s612_s13, 6 }
  0x18   : > { %s149_s15 = scalar_lea.hbm %s789_s1, %s393_s6  ;;  %s142_s16 = scalar_lea.vmem [#allocation5], %s379_s4 }
  0x19   : > { %s152_s19 = sshll.u32 %s142_s16, 4  ;;  %s150_s24 = sshll.u32 %s149_s15, 4  ;;  %s153_s19 = int_to_ptr.vmem [resolvable:$true] %s152_s19  ;;  %s151_s24 = int_to_ptr.hbm [resolvable:$true] %s150_s24 }
  0x1a   : > { %s730_s23 = scalar_select %p59_p10, %s604_s11, %s61_s17  }
  0x1b   : > { %s139_s25 = scalar_lea.sflag [#allocation6], %s138_s3  ;;  %s619_s27 = smov 256  }
  0x1c   : > { %s620_s28 = smov 16   ;;  %164 = sbr.rel (%p701_p12) target bundleno = 178 (0xb2), region = 28 }
  0x1d   : > { %410 = dma.hbm_to_vmem [thread:$0]  (!%p713_p4), %s151_s24, 1024, %s153_s19, %s139_s25, %s619_s27, %s619_s27, %s620_s28  }
  0x21   : > { %583 = dma.done.wait (%p674_p3), [#allocation3], 32  }
  0x22   : > { %585 = vsyncadd (%p674_p3), [#allocation3], 4294967264  ;;  %s741_s17 = sand.u32 1, %s600_s10  }
  0x23   : > { %s384_s3 = sshll.u32 %s741_s17, 6  ;;  %s172_s4 = scalar_lea.sflag [#allocation6], %s741_s17 }
  0x24   : > { %s175_s5 = scalar_lea.vmem [#allocation5], %s384_s3 }
  0x25   : > { %587 = dma.done.wait (%p684_p7), %s172_s4, 1024  }
  0x26   : > { %589 = vsyncadd (%p684_p7), %s172_s4, 4294966272  ;;  %v207_v0 = vld [vmem:[%s175_s5 + $0x38] sm:$0xff]  ;;  %v206_v1 = vld [vmem:[%s175_s5 + $0x30] sm:$0xff]  ;;  %vm208_vm0 = vcmask 261120   ;;  %s385_s18 = sshll.u32 %s741_s17, 2  ;;  %s394_s20 = sshll.u32 %s608_s12, 2 }
  0x27   : > { %v205_v2 = vld [vmem:[%s175_s5 + $0x28] sm:$0xff]  ;;  %244 = vmatpush.msra.mxu1 %v207_v0  ;;  %224 = vmatpush.msra.mxu0 %v206_v1  ;;  %v204_v3 = vld [vmem:[%s175_s5 + $0x20] sm:$0xff]  ;;  %v203_v4 = vld [vmem:[%s175_s5 + $0x18] sm:$0xff]  ;;  %s273_s6 = scalar_lea.hbm %s790_s2, %s394_s20  ;;  %s196_s7 = scalar_lea.vmem [#allocation7], %s385_s18  ;;  %vm255_vm1 = vcmask 1041408  }
  0x28   : > { %v202_v5 = vld [vmem:[%s175_s5 + $0x10] sm:$0xff]  ;;  %v201_v6 = vld [vmem:[%s175_s5 + $0x8] sm:$0xff]  ;;  %v200_v7 = vld [vmem:[%s175_s5] sm:$0xff]  ;;  %s275_s8 = sshll.u32 %s196_s7, 4  ;;  %s277_s15 = sshll.u32 %s273_s6, 4  ;;  %s276_s8 = int_to_ptr.vmem [resolvable:$true] %s275_s8  ;;  %s278_s15 = int_to_ptr.hbm [resolvable:$true] %s277_s15 }
  0x29   : > { %245 = vmatpush.msra.mxu1 %v205_v2  ;;  %225 = vmatpush.msra.mxu0 %v204_v3  ;;  %v199_v8 = vld [vmem:[#allocation2] sm:$0x3]  ;;  %s260_s16 = scalar_lea.sflag [#allocation4], %s741_s17  ;;  %s544_s19 = sshra.s32 %s278_s15, 4  ;;  %s545_s19 = int_to_ptr.hbm [resolvable:$true] %s544_s19 }
  0x2a   : > { %s546_s12 = scalar_lea.hbm %s545_s19, 4  ;;  %s550_s27 = scalar_lea.hbm %s790_s2, 8 }
  0x2b   : > { %246 = vmatpush.msra.mxu1 %v203_v4  ;;  %226 = vmatpush.msra.mxu0 %v202_v5  ;;  %p547_p3 = scmp.ne.s32.totalorder %s545_s19, %s546_s12  ;;  %p551_p11 = scmp.lt.s32.totalorder %s545_s19, %s790_s2 }
  0x2c   : > { %p552_p12 = scmp.lt.s32.totalorder %s550_s27, %s546_s12 }
  0x2d   : > { %247 = vmatpush.msra.mxu1 %v201_v6  ;;  %227 = vmatpush.msra.mxu0 %v200_v7  ;;  %p548_p5 = pnand %p547_p3, %p688_p8 }
  0x2e   : > { %387 = vmatmul.msk.f32.vlgmr.msra.gmra.mxu1 %vm208_vm0, %v199_v8  ;;  %386 = vmatmul.msk.f32.vlgmr.msra.gmra.mxu0 %vm208_vm0, %v199_v8  ;;  %p553_p0 = por %p552_p12, %p551_p11 }
  0x2f   : > { %p549_p7 = pneg %p548_p5 }
  0x31   : > { %p554_p1 = pnand %p553_p0, %p549_p7 }
  0xab   : > { %v249_v9 = vpop.f32.mrf.mxu1  ;;  %v229_v10 = vpop.f32.mrf.mxu0 }
  0xac   : > { %v254_v11 = vrot.slane %v249_v9, 6 }
  0xae   : > { %v256_v12 = vsel %vm255_vm1, %v229_v10, %v254_v11 }
  0xaf   : > { %258 = vst [vmem:[%s196_s7] sm:$0xf] %v256_v12 }
  0xb0   : > { %557 = shalt.err (!%p554_p1)
}
  0xb1   : > { %401 = dma.vmem_to_hbm [thread:$0]  (%p688_p8), %s276_s8, 64, %s278_s15, %s260_s16  }
  0xb2 PF: > { %s289_s17 = sand.u32 1, %s596_s9   ;;  %p412_p2 = pnand %p378_p13, %p692_p9 }
  0xb3   : > { %s290_s4 = scalar_lea.sflag [#allocation4], %s289_s17 }
  0xb4   : > { %p413_p4 = pneg %p412_p2 }
  0xb6   : > { %591 = dma.done.wait (%p413_p4), %s290_s4, 64  }
  0xb7   : > { %593 = vsyncadd (%p413_p4), %s290_s4, 4294967232  ;;  %s19_s14 = sadd.s32 1, %s616_s14   ;;  %s798_s9 = smov %s600_s10 }
  0xb8   : > { %p16_p6 = scmp.ge.s32.totalorder %s19_s14, 4   ;;  %s799_s10 = smov %s604_s11 }
  0xb9   : > { %s800_s11 = smov %s730_s23  ;;  %s801_s12 = smov %s612_s13 }
  0xba   : > { %s802_s13 = smov %s804_s30  ;;  %18 = sbr.rel (!%p16_p6) target bundleno = 7 (0x7), region = 78 }
  0xbf   :  { %296 = vsyncpa [#allocation3], 1 }
  0xc0   :  { %298 = vsyncpa [#allocation3 + $0x1], 1 }
  0xc1   :  { %299 = vsyncpa [#allocation6], 1 }
  0xc2   :  { %301 = vsyncpa [#allocation6 + $0x1], 1 }
  0xc3   :  { %302 = vsyncpa [#allocation4], 1 }
  0xc4   :  { %304 = vsyncpa [#allocation4 + $0x1], 1 }

</bundles_post_ra>
